<compile_context>
chip_gen: v6e
topology: v6e:2x2x1
jax: 0.10.0
libtpu: 0.0.40
codegen_flags: <defaults>
</compile_context>

<pallas_src>
import functools

import jax
import jax.numpy as jnp
from jax.experimental import pallas as pl
from jax.experimental.pallas import tpu as pltpu

SELU_ALPHA = 1.6732632423543772848170429916717
SELU_SCALE = 1.0507009873554804934193349852946
LANE = 128
ROW_PAD = 32  # sublane padding for rows; keeps int8/bf16 packed layouts native


def _round_up(x, m):
    return (x + m - 1) // m * m


def _pad2(x, rows, cols):
    return jnp.pad(x, ((0, rows - x.shape[0]), (0, cols - x.shape[1])))


def _pick_tile(total, want, unit):
    """Largest multiple of `unit`, <= min(want, total), that divides `total`."""
    t = max(unit, min(want, total))
    t = (t // unit) * unit
    while total % t:
        t -= unit
    return t


def _vmem_limit_bytes():
    # ~7/8 of physical VMEM, capped at 96 MiB (=> ~56 MiB on v7x, 96 MiB on v5e/v6e).
    try:
        cap = pltpu.get_tpu_info().vmem_capacity_bytes
        return int(min(cap - cap // 8, 96 * 1024 * 1024))
    except Exception:
        return None  # let the compiler use its default scoped limit


def _sage_layer_kernel(a_ref, hsrc_ref, hdst_ref, dinv_ref, w_ref, b_ref,
                       o_ref, acc_ref, *, activation, d_in_pad, d_out_valid):
    """Fused SAGEConv('mean') layer, tiled over (dst-row tiles, src-node tiles).

    Every k step:   acc += A_tile @ h_src_tile         (bf16 MXU, f32 accumulate)
    At k == last:   agg = acc * (1/deg)                 (exact mean, f32 scale)
                    z   = h_dst @ W_self + agg @ W_neigh + bias
                    out = SELU(z) | softmax(z) | sigmoid(z)
    """
    k = pl.program_id(1)

    @pl.when(k == 0)
    def _():
        acc_ref[...] = jnp.zeros_like(acc_ref)

    # int8 {0,1} adjacency from HBM; VPU cast is free filler under the HBM-bound regime.
    a = a_ref[...].astype(jnp.float32).astype(jnp.bfloat16)
    acc_ref[...] += jnp.dot(a, hsrc_ref[...], preferred_element_type=jnp.float32)

    @pl.when(k == pl.num_programs(1) - 1)
    def _():
        # Exact mean aggregation: f32 per-row degree reciprocal applied once.
        agg = (acc_ref[...] * dinv_ref[...]).astype(jnp.bfloat16)
        # Two dots on static ref slices (no materialized concat buffer).
        z = jnp.dot(hdst_ref[...], w_ref[:d_in_pad, :],
                    preferred_element_type=jnp.float32)
        z = z + jnp.dot(agg, w_ref[d_in_pad:, :],
                        preferred_element_type=jnp.float32)
        z = z + b_ref[...]
        if activation == "selu":
            out = SELU_SCALE * jnp.where(z > 0, z, SELU_ALPHA * (jnp.exp(z) - 1.0))
        elif activation == "softmax":
            # Mask zero-padded output lanes so they do not contaminate the softmax.
            cols = jax.lax.broadcasted_iota(jnp.int32, z.shape, 1)
            z = jnp.where(cols < d_out_valid, z, -1e30)
            m = jnp.max(z, axis=-1, keepdims=True)
            e = jnp.exp(z - m)
            out = e * pl.reciprocal(jnp.sum(e, axis=-1, keepdims=True), approx=True)
        else:  # "sigmoid"
            out = 1.0 / (1.0 + jnp.exp(-z))
        o_ref[...] = out.astype(o_ref.dtype)


def sage_conv(adj01, h_src, h_dst, w_stacked, bias, activation, d_out_valid,
              out_dtype, *, tm=512, tk=1024):
    """One SAGEConv('mean') layer via a single tiled Pallas call.

    `adj01` is the dense {0,1} block adjacency (n_dst, n_src). Feature dims of
    h_src/h_dst/w_stacked/bias must already be lane-padded to a multiple of 128.
    """
    n_dst, n_src = adj01.shape
    d_in_pad = h_src.shape[1]
    d_out_pad = w_stacked.shape[1]

    # Tight padding (multiples of ROW_PAD / LANE only); tiles must divide the padded
    # extents so no all-zero adjacency columns are streamed through HBM/MXU.
    n_dst_p = _round_up(n_dst, ROW_PAD)
    n_src_p = _round_up(n_src, LANE)
    tm = _pick_tile(n_dst_p, tm, ROW_PAD)
    # Megacore: keep >= 2 dst-row tiles when possible so "parallel" shards across
    # both TensorCores on v7x instead of idling one.
    if n_dst_p // tm < 2 and n_dst_p >= 2 * ROW_PAD:
        tm = _pick_tile(n_dst_p, n_dst_p // 2, ROW_PAD)
    tk = _pick_tile(n_src_p, tk, LANE)

    # {0,1} adjacency as int8 (half the HBM bytes of bf16, exact) + f32 1/deg.
    a_i8 = _pad2(adj01, n_dst_p, n_src_p).astype(jnp.int8)
    deg = jnp.maximum(jnp.sum(adj01.astype(jnp.float32), axis=1, keepdims=True), 1.0)
    dinv = _pad2(1.0 / deg, n_dst_p, 1).astype(jnp.float32)
    hs = _pad2(h_src, n_src_p, d_in_pad).astype(jnp.bfloat16)
    hd = _pad2(h_dst, n_dst_p, d_in_pad).astype(jnp.bfloat16)

    grid = (n_dst_p // tm, n_src_p // tk)
    kernel = functools.partial(_sage_layer_kernel, activation=activation,
                               d_in_pad=d_in_pad, d_out_valid=d_out_valid)

    def _call(single_buffer_weights):
        w_mode = ({"pipeline_mode": pl.Buffered(buffer_count=1)}
                  if single_buffer_weights else {})
        return pl.pallas_call(
            kernel,
            out_shape=jax.ShapeDtypeStruct((n_dst_p, d_out_pad), out_dtype),
            grid_spec=pltpu.PrefetchScalarGridSpec(
                num_scalar_prefetch=0,
                grid=grid,
                in_specs=[
                    pl.BlockSpec((tm, tk), lambda m, k: (m, k)),           # A (int8 0/1)
                    pl.BlockSpec((tk, d_in_pad), lambda m, k: (k, 0)),     # h_src
                    pl.BlockSpec((tm, d_in_pad), lambda m, k: (m, 0)),     # h_dst
                    pl.BlockSpec((tm, 1), lambda m, k: (m, 0)),            # 1/deg (f32)
                    pl.BlockSpec((2 * d_in_pad, d_out_pad),
                                 lambda m, k: (0, 0), **w_mode),           # W (resident)
                    pl.BlockSpec((1, d_out_pad),
                                 lambda m, k: (0, 0), **w_mode),           # bias (resident)
                ],
                out_specs=pl.BlockSpec((tm, d_out_pad), lambda m, k: (m, 0)),
                scratch_shapes=[pltpu.VMEM((tm, d_in_pad), jnp.float32)],
            ),
            compiler_params=pltpu.CompilerParams(
                dimension_semantics=("parallel", "arbitrary"),
                vmem_limit_bytes=_vmem_limit_bytes(),
            ),
        )(a_i8, hs, hd, dinv, w_stacked, bias)

    try:
        out = _call(True)
    except Exception:
        # pipeline_mode/Buffered not supported on this jax version: fall back to the
        # default double-buffered resident weights.
        out = _call(False)
    return out[:n_dst]


def _prepare_layer_params(w_self, w_neigh, bias, d_in_pad, d_out_pad):
    """Stack [W_self; W_neigh] into one lane-dense bf16 weight and pad the bias."""
    d_in, d_out = w_self.shape
    w = jnp.zeros((2 * d_in_pad, d_out_pad), jnp.float32)
    w = w.at[:d_in, :d_out].set(w_self)
    w = w.at[d_in_pad:d_in_pad + d_in, :d_out].set(w_neigh)
    b = jnp.zeros((1, d_out_pad), jnp.float32)
    b = b.at[:, :d_out].set(bias)
    return w.astype(jnp.bfloat16), b


def graphsage_forward(block_adjs, x, params, n_classes):
    """Mirrors GraphSAGE.forward (works for n_layers >= 1)."""
    # TODO(synk): fuse all layers into a single pallas_call keeping h in VMEM.
    n_layers = len(params)
    h = x
    for i in range(n_layers):
        a = block_adjs[i]
        w_self, w_neigh, b = params[i]
        d_in, d_out = w_self.shape
        d_in_pad = _round_up(d_in, LANE)
        d_out_pad = _round_up(d_out, LANE)

        h_p = _pad2(h, h.shape[0], d_in_pad)     # lane-pad features with zeros
        h_dst = h_p[: a.shape[0]]                # h[:num_dst_nodes]
        w_st, b_p = _prepare_layer_params(w_self, w_neigh, b, d_in_pad, d_out_pad)

        if i == n_layers - 1:
            act = "softmax" if n_classes > 1 else "sigmoid"
            out_dtype = jnp.float32
        else:
            act = "selu"
            out_dtype = jnp.bfloat16             # feeds next layer's bf16 matmuls

        h = sage_conv(a, h_p, h_dst, w_st, b_p, act, d_out, out_dtype)

    return h[:, : params[-1][0].shape[1]]        # drop lane padding


def _make_block_adj(key, n_dst, n_src, p=0.3):
    """Dense {0,1} adjacency (unnormalized) for one DGL block."""
    adj = jax.random.bernoulli(key, p, (n_dst, n_src)).astype(jnp.float32)
    # DGL convention: the first n_dst src nodes are the dst nodes; add self edges
    # so every dst node has in-degree >= 1.
    eye = jnp.zeros((n_dst, n_src), jnp.float32).at[
        jnp.arange(n_dst), jnp.arange(n_dst)].set(1.0)
    return jnp.maximum(adj, eye)


def _init_sage_params(key, d_in, d_out, scale=0.1):
    k1, k2, k3 = jax.random.split(key, 3)
    w_self = scale * jax.random.normal(k1, (d_in, d_out), jnp.float32)
    w_neigh = scale * jax.random.normal(k2, (d_in, d_out), jnp.float32)
    bias = scale * jax.random.normal(k3, (1, d_out), jnp.float32)
    return w_self, w_neigh, bias


if __name__ == "__main__":
    # Small deterministic config: in_feats=16, n_hidden=32, n_classes=4, n_layers=3.
    in_feats, n_hidden, n_classes, n_layers = 16, 32, 4, 3
    # Sampled-block node counts (src includes dst as a prefix, DGL convention).
    block_sizes = [(32, 64), (16, 32), (8, 16)]   # (n_dst, n_src) per layer

    root = jax.random.PRNGKey(0)
    k_x, k_adj, k_par = jax.random.split(root, 3)

    x = jax.random.normal(k_x, (block_sizes[0][1], in_feats), jnp.float32)

    adj_keys = jax.random.split(k_adj, n_layers)
    block_adjs = [_make_block_adj(adj_keys[i], *block_sizes[i]) for i in range(n_layers)]

    par_keys = jax.random.split(k_par, n_layers)
    dims = [in_feats] + [n_hidden] * (n_layers - 1) + [n_classes]
    params = [_init_sage_params(par_keys[i], dims[i], dims[i + 1])
              for i in range(n_layers)]

    out = graphsage_forward(block_adjs, x, params, n_classes)
    out = jax.block_until_ready(out)

    assert out.shape == (block_sizes[-1][0], n_classes)
    # Softmax rows should sum to ~1 (bf16 matmuls + approx reciprocal -> loose tol).
    assert bool(jnp.allclose(jnp.sum(out, axis=1), 1.0, atol=5e-3))
    print("KERNEL_OK")
</pallas_src>

<mosaic_0001>
module attributes {stable_mosaic.version = 11 : i64} {
  func.func @_sage_layer_kernel(%arg0: i32, %arg1: i32, %arg2: memref<32x128xi8, #tpu.memory_space<vmem>>, %arg3: memref<128x128xbf16, #tpu.memory_space<vmem>>, %arg4: memref<32x128xbf16, #tpu.memory_space<vmem>>, %arg5: memref<32x1xf32, #tpu.memory_space<vmem>>, %arg6: memref<256x128xbf16, #tpu.memory_space<vmem>>, %arg7: memref<1x128xf32, #tpu.memory_space<vmem>>, %arg8: memref<32x128xbf16, #tpu.memory_space<vmem>>, %arg9: memref<32x128xf32, #tpu.memory_space<vmem>>) attributes {dimension_semantics = [#tpu.dimension_semantics<parallel>, #tpu.dimension_semantics<arbitrary>], iteration_bounds = array<i64: 1, 1>, scalar_prefetch = 0 : i64, scratch_operands = 1 : i64, tpu.core_type = #tpu.core_type<tc>, window_params = [{transform_indices = @transform_0, window_bounds = array<i64: 32, 128>}, {transform_indices = @transform_1, window_bounds = array<i64: 128, 128>}, {transform_indices = @transform_2, window_bounds = array<i64: 32, 128>}, {transform_indices = @transform_3, window_bounds = array<i64: 32, 1>}, {pipeline_mode = #tpu.pipeline_mode<synchronous>, transform_indices = @transform_4, window_bounds = array<i64: 256, 128>}, {pipeline_mode = #tpu.pipeline_mode<synchronous>, transform_indices = @transform_5, window_bounds = array<i64: 1, 128>}, {transform_indices = @transform_6, window_bounds = array<i64: 32, 128>}]} {
    %c0_i32 = arith.constant 0 : i32
    %0 = arith.cmpi eq, %arg1, %c0_i32 : i32
    %1 = arith.extui %0 : i1 to i32
    %c0_i32_0 = arith.constant 0 : i32
    %2 = arith.cmpi ne, %1, %c0_i32_0 : i32
    scf.if %2 {
      %cst_10 = arith.constant 0.000000e+00 : f32
      %14 = vector.broadcast %cst_10 : f32 to vector<32x128xf32>
      %c0_11 = arith.constant 0 : index
      %c0_12 = arith.constant 0 : index
      %15 = vector.load %arg9[%c0_11, %c0_12] : memref<32x128xf32, #tpu.memory_space<vmem>>, vector<32x128xf32>
      tpu.vector_store %arg9[%c0_11, %c0_12], %14 {strides = array<i32>} : memref<32x128xf32, #tpu.memory_space<vmem>>, vector<32x128xf32>,
    } else {
    }
    %c0 = arith.constant 0 : index
    %c0_1 = arith.constant 0 : index
    %3 = vector.load %arg2[%c0, %c0_1] : memref<32x128xi8, #tpu.memory_space<vmem>>, vector<32x128xi8>
    %4 = arith.sitofp %3 : vector<32x128xi8> to vector<32x128xf32>
    %5 = arith.truncf %4 : vector<32x128xf32> to vector<32x128xbf16>
    %c0_2 = arith.constant 0 : index
    %c0_3 = arith.constant 0 : index
    %6 = vector.load %arg9[%c0_2, %c0_3] : memref<32x128xf32, #tpu.memory_space<vmem>>, vector<32x128xf32>
    %c0_4 = arith.constant 0 : index
    %c0_5 = arith.constant 0 : index
    %7 = vector.load %arg3[%c0_4, %c0_5] : memref<128x128xbf16, #tpu.memory_space<vmem>>, vector<128x128xbf16>
    %cst = arith.constant dense<0.000000e+00> : vector<32x128xf32>
    %8 = tpu.matmul %5, %7, %cst {dimension_numbers = #tpu.dot_dimension_numbers<[1], [0], [0], [1], [0, 0, 1, 1], [], []>} : vector<32x128xbf16>, vector<128x128xbf16>, vector<32x128xf32> -> vector<32x128xf32>
    %9 = arith.addf %6, %8 : vector<32x128xf32>
    %c0_6 = arith.constant 0 : index
    %c0_7 = arith.constant 0 : index
    %10 = vector.load %arg9[%c0_6, %c0_7] : memref<32x128xf32, #tpu.memory_space<vmem>>, vector<32x128xf32>
    tpu.vector_store %arg9[%c0_6, %c0_7], %9 {strides = array<i32>} : memref<32x128xf32, #tpu.memory_space<vmem>>, vector<32x128xf32>,
    %c0_i32_8 = arith.constant 0 : i32
    %11 = arith.cmpi eq, %arg1, %c0_i32_8 : i32
    %12 = arith.extui %11 : i1 to i32
    %c0_i32_9 = arith.constant 0 : i32
    %13 = arith.cmpi ne, %12, %c0_i32_9 : i32
    scf.if %13 {
      %c0_10 = arith.constant 0 : index
      %c0_11 = arith.constant 0 : index
      %14 = vector.load %arg9[%c0_10, %c0_11] : memref<32x128xf32, #tpu.memory_space<vmem>>, vector<32x128xf32>
      %c0_12 = arith.constant 0 : index
      %c0_13 = arith.constant 0 : index
      %15 = vector.load %arg5[%c0_12, %c0_13] : memref<32x1xf32, #tpu.memory_space<vmem>>, vector<32x1xf32>
      %16 = vector.broadcast %15 : vector<32x1xf32> to vector<32x128xf32>
      %17 = arith.mulf %14, %16 : vector<32x128xf32>
      %18 = arith.truncf %17 : vector<32x128xf32> to vector<32x128xbf16>
      %c0_14 = arith.constant 0 : index
      %c0_15 = arith.constant 0 : index
      %19 = vector.load %arg4[%c0_14, %c0_15] : memref<32x128xbf16, #tpu.memory_space<vmem>>, vector<32x128xbf16>
      %c0_16 = arith.constant 0 : index
      %c0_17 = arith.constant 0 : index
      %20 = vector.load %arg6[%c0_16, %c0_17] : memref<256x128xbf16, #tpu.memory_space<vmem>>, vector<128x128xbf16>
      %cst_18 = arith.constant dense<0.000000e+00> : vector<32x128xf32>
      %21 = tpu.matmul %19, %20, %cst_18 {dimension_numbers = #tpu.dot_dimension_numbers<[1], [0], [0], [1], [0, 0, 1, 1], [], []>} : vector<32x128xbf16>, vector<128x128xbf16>, vector<32x128xf32> -> vector<32x128xf32>
      %c128 = arith.constant 128 : index
      %c0_19 = arith.constant 0 : index
      %22 = vector.load %arg6[%c128, %c0_19] : memref<256x128xbf16, #tpu.memory_space<vmem>>, vector<128x128xbf16>
      %cst_20 = arith.constant dense<0.000000e+00> : vector<32x128xf32>
      %23 = tpu.matmul %18, %22, %cst_20 {dimension_numbers = #tpu.dot_dimension_numbers<[1], [0], [0], [1], [0, 0, 1, 1], [], []>} : vector<32x128xbf16>, vector<128x128xbf16>, vector<32x128xf32> -> vector<32x128xf32>
      %24 = arith.addf %21, %23 : vector<32x128xf32>
      %c0_21 = arith.constant 0 : index
      %c0_22 = arith.constant 0 : index
      %25 = vector.load %arg7[%c0_21, %c0_22] : memref<1x128xf32, #tpu.memory_space<vmem>>, vector<1x128xf32>
      %26 = vector.broadcast %25 : vector<1x128xf32> to vector<32x128xf32>
      %27 = arith.addf %24, %26 : vector<32x128xf32>
      %cst_23 = arith.constant 0.000000e+00 : f32
      %28 = vector.broadcast %cst_23 : f32 to vector<32x128xf32>
      %29 = arith.cmpf ogt, %27, %28 : vector<32x128xf32>
      %30 = math.exp %27 : vector<32x128xf32>
      %cst_24 = arith.constant 1.000000e+00 : f32
      %31 = vector.broadcast %cst_24 : f32 to vector<32x128xf32>
      %32 = arith.subf %30, %31 : vector<32x128xf32>
      %cst_25 = arith.constant 1.67326319 : f32
      %33 = vector.broadcast %cst_25 : f32 to vector<32x128xf32>
      %34 = arith.mulf %33, %32 : vector<32x128xf32>
      %35 = arith.select %29, %27, %34 : vector<32x128xi1>, vector<32x128xf32>
      %cst_26 = arith.constant 1.05070102 : f32
      %36 = vector.broadcast %cst_26 : f32 to vector<32x128xf32>
      %37 = arith.mulf %36, %35 : vector<32x128xf32>
      %38 = arith.truncf %37 : vector<32x128xf32> to vector<32x128xbf16>
      %c0_27 = arith.constant 0 : index
      %c0_28 = arith.constant 0 : index
      %39 = vector.load %arg8[%c0_27, %c0_28] : memref<32x128xbf16, #tpu.memory_space<vmem>>, vector<32x128xbf16>
      tpu.vector_store %arg8[%c0_27, %c0_28], %38 {strides = array<i32>} : memref<32x128xbf16, #tpu.memory_space<vmem>>, vector<32x128xbf16>,
    } else {
    }
    return
  }
  func.func @transform_0(%arg0: i32, %arg1: i32) -> (i32, i32) {
    %c0_i32 = arith.constant 0 : i32
    return %arg0, %arg1 : i32, i32
  }
  func.func @transform_1(%arg0: i32, %arg1: i32) -> (i32, i32) {
    %c0_i32 = arith.constant 0 : i32
    %c0_i32_0 = arith.constant 0 : i32
    return %arg1, %c0_i32 : i32, i32
  }
  func.func @transform_2(%arg0: i32, %arg1: i32) -> (i32, i32) {
    %c0_i32 = arith.constant 0 : i32
    %c0_i32_0 = arith.constant 0 : i32
    return %arg0, %c0_i32 : i32, i32
  }
  func.func @transform_3(%arg0: i32, %arg1: i32) -> (i32, i32) {
    %c0_i32 = arith.constant 0 : i32
    %c0_i32_0 = arith.constant 0 : i32
    return %arg0, %c0_i32 : i32, i32
  }
  func.func @transform_4(%arg0: i32, %arg1: i32) -> (i32, i32) {
    %c0_i32 = arith.constant 0 : i32
    %c0_i32_0 = arith.constant 0 : i32
    %c0_i32_1 = arith.constant 0 : i32
    return %c0_i32, %c0_i32_0 : i32, i32
  }
  func.func @transform_5(%arg0: i32, %arg1: i32) -> (i32, i32) {
    %c0_i32 = arith.constant 0 : i32
    %c0_i32_0 = arith.constant 0 : i32
    %c0_i32_1 = arith.constant 0 : i32
    return %c0_i32, %c0_i32_0 : i32, i32
  }
  func.func @transform_6(%arg0: i32, %arg1: i32) -> (i32, i32) {
    %c0_i32 = arith.constant 0 : i32
    %c0_i32_0 = arith.constant 0 : i32
    return %arg0, %c0_i32 : i32, i32
  }
}

module attributes {stable_mosaic.version = 11 : i64} {
  func.func @_sage_layer_kernel(%arg0: i32, %arg1: i32, %arg2: memref<32x128xi8, #tpu.memory_space<vmem>>, %arg3: memref<128x128xbf16, #tpu.memory_space<vmem>>, %arg4: memref<32x128xbf16, #tpu.memory_space<vmem>>, %arg5: memref<32x1xf32, #tpu.memory_space<vmem>>, %arg6: memref<256x128xbf16, #tpu.memory_space<vmem>>, %arg7: memref<1x128xf32, #tpu.memory_space<vmem>>, %arg8: memref<32x128xbf16, #tpu.memory_space<vmem>>, %arg9: memref<32x128xf32, #tpu.memory_space<vmem>>) attributes {dimension_semantics = [#tpu.dimension_semantics<parallel>, #tpu.dimension_semantics<arbitrary>], iteration_bounds = array<i64: 1, 1>, scalar_prefetch = 0 : i64, scratch_operands = 1 : i64, tpu.core_type = #tpu.core_type<tc>, window_params = [{transform_indices = @transform_0, window_bounds = array<i64: 32, 128>}, {transform_indices = @transform_1, window_bounds = array<i64: 128, 128>}, {transform_indices = @transform_2, window_bounds = array<i64: 32, 128>}, {transform_indices = @transform_3, window_bounds = array<i64: 32, 1>}, {pipeline_mode = #tpu.pipeline_mode<synchronous>, transform_indices = @transform_4, window_bounds = array<i64: 256, 128>}, {pipeline_mode = #tpu.pipeline_mode<synchronous>, transform_indices = @transform_5, window_bounds = array<i64: 1, 128>}, {transform_indices = @transform_6, window_bounds = array<i64: 32, 128>}]} {
    %c0_i32 = arith.constant 0 : i32
    %0 = arith.cmpi eq, %arg1, %c0_i32 : i32
    %1 = arith.extui %0 : i1 to i32
    %c0_i32_0 = arith.constant 0 : i32
    %2 = arith.cmpi ne, %1, %c0_i32_0 : i32
    scf.if %2 {
      %cst_10 = arith.constant 0.000000e+00 : f32
      %14 = vector.broadcast %cst_10 : f32 to vector<32x128xf32>
      %c0_11 = arith.constant 0 : index
      %c0_12 = arith.constant 0 : index
      %15 = vector.load %arg9[%c0_11, %c0_12] : memref<32x128xf32, #tpu.memory_space<vmem>>, vector<32x128xf32>
      tpu.vector_store %arg9[%c0_11, %c0_12], %14 {strides = array<i32>} : memref<32x128xf32, #tpu.memory_space<vmem>>, vector<32x128xf32>,
    } else {
    }
    %c0 = arith.constant 0 : index
    %c0_1 = arith.constant 0 : index
    %3 = vector.load %arg2[%c0, %c0_1] : memref<32x128xi8, #tpu.memory_space<vmem>>, vector<32x128xi8>
    %4 = arith.sitofp %3 : vector<32x128xi8> to vector<32x128xf32>
    %5 = arith.truncf %4 : vector<32x128xf32> to vector<32x128xbf16>
    %c0_2 = arith.constant 0 : index
    %c0_3 = arith.constant 0 : index
    %6 = vector.load %arg9[%c0_2, %c0_3] : memref<32x128xf32, #tpu.memory_space<vmem>>, vector<32x128xf32>
    %c0_4 = arith.constant 0 : index
    %c0_5 = arith.constant 0 : index
    %7 = vector.load %arg3[%c0_4, %c0_5] : memref<128x128xbf16, #tpu.memory_space<vmem>>, vector<128x128xbf16>
    %cst = arith.constant dense<0.000000e+00> : vector<32x128xf32>
    %8 = tpu.matmul %5, %7, %cst {dimension_numbers = #tpu.dot_dimension_numbers<[1], [0], [0], [1], [0, 0, 1, 1], [], []>} : vector<32x128xbf16>, vector<128x128xbf16>, vector<32x128xf32> -> vector<32x128xf32>
    %9 = arith.addf %6, %8 : vector<32x128xf32>
    %c0_6 = arith.constant 0 : index
    %c0_7 = arith.constant 0 : index
    %10 = vector.load %arg9[%c0_6, %c0_7] : memref<32x128xf32, #tpu.memory_space<vmem>>, vector<32x128xf32>
    tpu.vector_store %arg9[%c0_6, %c0_7], %9 {strides = array<i32>} : memref<32x128xf32, #tpu.memory_space<vmem>>, vector<32x128xf32>,
    %c0_i32_8 = arith.constant 0 : i32
    %11 = arith.cmpi eq, %arg1, %c0_i32_8 : i32
    %12 = arith.extui %11 : i1 to i32
    %c0_i32_9 = arith.constant 0 : i32
    %13 = arith.cmpi ne, %12, %c0_i32_9 : i32
    scf.if %13 {
      %c0_10 = arith.constant 0 : index
      %c0_11 = arith.constant 0 : index
      %14 = vector.load %arg9[%c0_10, %c0_11] : memref<32x128xf32, #tpu.memory_space<vmem>>, vector<32x128xf32>
      %c0_12 = arith.constant 0 : index
      %c0_13 = arith.constant 0 : index
      %15 = vector.load %arg5[%c0_12, %c0_13] : memref<32x1xf32, #tpu.memory_space<vmem>>, vector<32x1xf32>
      %16 = vector.broadcast %15 : vector<32x1xf32> to vector<32x128xf32>
      %17 = arith.mulf %14, %16 : vector<32x128xf32>
      %18 = arith.truncf %17 : vector<32x128xf32> to vector<32x128xbf16>
      %c0_14 = arith.constant 0 : index
      %c0_15 = arith.constant 0 : index
      %19 = vector.load %arg4[%c0_14, %c0_15] : memref<32x128xbf16, #tpu.memory_space<vmem>>, vector<32x128xbf16>
      %c0_16 = arith.constant 0 : index
      %c0_17 = arith.constant 0 : index
      %20 = vector.load %arg6[%c0_16, %c0_17] : memref<256x128xbf16, #tpu.memory_space<vmem>>, vector<128x128xbf16>
      %cst_18 = arith.constant dense<0.000000e+00> : vector<32x128xf32>
      %21 = tpu.matmul %19, %20, %cst_18 {dimension_numbers = #tpu.dot_dimension_numbers<[1], [0], [0], [1], [0, 0, 1, 1], [], []>} : vector<32x128xbf16>, vector<128x128xbf16>, vector<32x128xf32> -> vector<32x128xf32>
      %c128 = arith.constant 128 : index
      %c0_19 = arith.constant 0 : index
      %22 = vector.load %arg6[%c128, %c0_19] : memref<256x128xbf16, #tpu.memory_space<vmem>>, vector<128x128xbf16>
      %cst_20 = arith.constant dense<0.000000e+00> : vector<32x128xf32>
      %23 = tpu.matmul %18, %22, %cst_20 {dimension_numbers = #tpu.dot_dimension_numbers<[1], [0], [0], [1], [0, 0, 1, 1], [], []>} : vector<32x128xbf16>, vector<128x128xbf16>, vector<32x128xf32> -> vector<32x128xf32>
      %24 = arith.addf %21, %23 : vector<32x128xf32>
      %c0_21 = arith.constant 0 : index
      %c0_22 = arith.constant 0 : index
      %25 = vector.load %arg7[%c0_21, %c0_22] : memref<1x128xf32, #tpu.memory_space<vmem>>, vector<1x128xf32>
      %26 = vector.broadcast %25 : vector<1x128xf32> to vector<32x128xf32>
      %27 = arith.addf %24, %26 : vector<32x128xf32>
      %cst_23 = arith.constant 0.000000e+00 : f32
      %28 = vector.broadcast %cst_23 : f32 to vector<32x128xf32>
      %29 = arith.cmpf ogt, %27, %28 : vector<32x128xf32>
      %30 = math.exp %27 : vector<32x128xf32>
      %cst_24 = arith.constant 1.000000e+00 : f32
      %31 = vector.broadcast %cst_24 : f32 to vector<32x128xf32>
      %32 = arith.subf %30, %31 : vector<32x128xf32>
      %cst_25 = arith.constant 1.67326319 : f32
      %33 = vector.broadcast %cst_25 : f32 to vector<32x128xf32>
      %34 = arith.mulf %33, %32 : vector<32x128xf32>
      %35 = arith.select %29, %27, %34 : vector<32x128xi1>, vector<32x128xf32>
      %cst_26 = arith.constant 1.05070102 : f32
      %36 = vector.broadcast %cst_26 : f32 to vector<32x128xf32>
      %37 = arith.mulf %36, %35 : vector<32x128xf32>
      %38 = arith.truncf %37 : vector<32x128xf32> to vector<32x128xbf16>
      %c0_27 = arith.constant 0 : index
      %c0_28 = arith.constant 0 : index
      %39 = vector.load %arg8[%c0_27, %c0_28] : memref<32x128xbf16, #tpu.memory_space<vmem>>, vector<32x128xbf16>
      tpu.vector_store %arg8[%c0_27, %c0_28], %38 {strides = array<i32>} : memref<32x128xbf16, #tpu.memory_space<vmem>>, vector<32x128xbf16>,
    } else {
    }
    return
  }
  func.func @transform_0(%arg0: i32, %arg1: i32) -> (i32, i32) {
    %c0_i32 = arith.constant 0 : i32
    return %arg0, %arg1 : i32, i32
  }
  func.func @transform_1(%arg0: i32, %arg1: i32) -> (i32, i32) {
    %c0_i32 = arith.constant 0 : i32
    %c0_i32_0 = arith.constant 0 : i32
    return %arg1, %c0_i32 : i32, i32
  }
  func.func @transform_2(%arg0: i32, %arg1: i32) -> (i32, i32) {
    %c0_i32 = arith.constant 0 : i32
    %c0_i32_0 = arith.constant 0 : i32
    return %arg0, %c0_i32 : i32, i32
  }
  func.func @transform_3(%arg0: i32, %arg1: i32) -> (i32, i32) {
    %c0_i32 = arith.constant 0 : i32
    %c0_i32_0 = arith.constant 0 : i32
    return %arg0, %c0_i32 : i32, i32
  }
  func.func @transform_4(%arg0: i32, %arg1: i32) -> (i32, i32) {
    %c0_i32 = arith.constant 0 : i32
    %c0_i32_0 = arith.constant 0 : i32
    %c0_i32_1 = arith.constant 0 : i32
    return %c0_i32, %c0_i32_0 : i32, i32
  }
  func.func @transform_5(%arg0: i32, %arg1: i32) -> (i32, i32) {
    %c0_i32 = arith.constant 0 : i32
    %c0_i32_0 = arith.constant 0 : i32
    %c0_i32_1 = arith.constant 0 : i32
    return %c0_i32, %c0_i32_0 : i32, i32
  }
  func.func @transform_6(%arg0: i32, %arg1: i32) -> (i32, i32) {
    %c0_i32 = arith.constant 0 : i32
    %c0_i32_0 = arith.constant 0 : i32
    return %arg0, %c0_i32 : i32, i32
  }
}

</mosaic_0001>

<bundles_post_ra>
// kernel: tpu_custom_call.1
= control target key start
LH: loop header
LB: loop body
LE: loop exit
PB: predicated region body
PF: predicated region fallthrough
CT: control target
= control target key end

     0   :  { %11 = vsyncpa [#allocation4], 0  ;;  %s876_s0 = inlined_call_operand.vmem [shape: s8[32,128], index: 0, kind: input, shape index: {}]   ;;  %s877_s1 = inlined_call_operand.hbm [shape: bf16[128,128], index: 1, kind: input, shape index: {}]   ;;  %s878_s2 = inlined_call_operand.vmem [shape: bf16[32,128], index: 2, kind: input, shape index: {}]   ;;  %s879_s3 = inlined_call_operand.vmem [shape: f32[32,1], index: 3, kind: input, shape index: {}]   ;;  %s880_s4 = inlined_call_operand.hbm [shape: bf16[256,128], index: 4, kind: input, shape index: {}]   ;;  %s881_s5 = inlined_call_operand.vmem [shape: f32[1,128], index: 5, kind: input, shape index: {}]   ;;  %s882_s6 = inlined_call_operand.hbm [shape: bf16[32,128], index: 6, kind: output, shape index: {}]  }
   0x1   :  { %12 = vsyncpa [#allocation7], 0 }
   0x2   :  { %13 = vsyncpa [#allocation5], 0  ;;  %s793_s21 = smov [#allocation3]  }
   0x3   :  { %s21_s22 = sshll.u32 %s793_s21, 4  ;;  %s22_s22 = int_to_ptr.vmem [resolvable:$true] %s21_s22 }
   0x4   :  { %s735_s23 = scalar_lea.vmem %s22_s22, 1024  ;;  %p740_p1 = scmp.lt.s32.totalorder %s22_s22, %s22_s22 }
   0x5   :  { %p736_p0 = scmp.ne.s32.totalorder %s22_s22, %s735_s23  ;;  %p741_p2 = scmp.lt.s32.totalorder %s735_s23, %s735_s23 }
   0x7   :  { %p742_p3 = por %p741_p2, %p740_p1 }
   0x9   :  { %p743_p4 = pnand %p742_p3, %p736_p0 }
   0xb   :  { %746 = shalt.err (!%p743_p4)
}
   0xc   :  { %s794_s24 = smov 64   ;;  %s795_s25 = smov 4  }
   0xd   :  { %27 = dma.hbm_to_vmem [thread:$0]  %s877_s1, 1024, %s22_s22, [#allocation4], %s794_s24, %s794_s24, %s795_s25  }
   0xe   :  { %s796_s28 = smov [#allocation6]  }
   0xf   :  { %s37_s29 = sshll.u32 %s796_s28, 4  ;;  %s38_s29 = int_to_ptr.vmem [resolvable:$true] %s37_s29 }
  0x10   :  { %s755_s30 = scalar_lea.vmem %s38_s29, 2048  ;;  %p760_p6 = scmp.lt.s32.totalorder %s38_s29, %s38_s29 }
  0x11   :  { %p756_p5 = scmp.ne.s32.totalorder %s38_s29, %s755_s30  ;;  %p761_p7 = scmp.lt.s32.totalorder %s755_s30, %s755_s30 }
  0x13   :  { %p762_p8 = por %p761_p7, %p760_p6 }
  0x15   :  { %p763_p9 = pnand %p762_p8, %p756_p5 }
  0x17   :  { %766 = shalt.err (!%p763_p9)
}
  0x18   :  { %43 = dma.hbm_to_vmem [thread:$0]  %s880_s4, 2048, %s38_s29, [#allocation7], %s794_s24, %s794_s24, %s795_s25  }
  0x19   :  { %787 = dma.done.wait [#allocation4], 1024  }
  0x1a   :  { %788 = vsyncadd [#allocation4], 4294966272 }
  0x1b   :  { %789 = dma.done.wait [#allocation7], 2048  }
  0x1c   :  { %790 = vsyncadd [#allocation7], 4294965248  ;;  %v797_v0 = vmov 0   ;;  %v693_v1 = vld [vmem:[#allocation3 + $0x38] sm:$0xff]   ;;  %v694_v2 = vld [vmem:[#allocation3 + $0x30] sm:$0xff]  }
  0x1d   :  { %691 = vset.pattern.permute.xlu0 %v797_v0  ;;  %692 = vset.pattern.permute.xlu1 %v797_v0  ;;  %v695_v3 = vld [vmem:[#allocation3 + $0x28] sm:$0xff]   ;;  %v696_v4 = vld [vmem:[#allocation3 + $0x20] sm:$0xff]   ;;  %v198_v7 = vld [vmem:[%s879_s3 + $0x10] sm:$0xff] }
  0x1e   :  { %625 = vmatprep.subr.bf16.mxu0 %v693_v1  ;;  %v61_v5 = vld [vmem:[%s876_s0] sm:$0xff]  ;;  %212 = vperm.xlu1 %692, %v198_v7   ;;  %v197_v9 = vld [vmem:[%s879_s3 + $0x8] sm:$0xff]  ;;  %v199_v10 = vld [vmem:[%s879_s3 + $0x18] sm:$0xff] }
  0x1f   :  { %626 = vmatpush3.bf16.msra.mxu0 %v693_v1  ;;  %v196_v6 = vld [vmem:[%s879_s3] sm:$0xff]  ;;  %v62_v8 = vunpack.c.l.s8.bf16 %v61_v5  ;;  %v697_v11 = vld [vmem:[#allocation3 + $0x18] sm:$0xff]   ;;  %v705_v13 = vld [vmem:[#allocation6 + $0x70] sm:$0xff]   ;;  %v63_v21 = vunpack.c.h.s8.bf16 %v61_v5 }
  0x20   :  { %627 = vmatprep.subr.bf16.mxu0 %v694_v2  ;;  %202 = vperm.xlu0 %691, %v196_v6   ;;  %v703_v12 = vld [vmem:[#allocation6 + $0x78] sm:$0xff]   ;;  %v698_v14 = vld [vmem:[#allocation3 + $0x10] sm:$0xff]   ;;  %v707_v15 = vld [vmem:[#allocation6 + $0x68] sm:$0xff]  }
  0x21   :  { %641 = vmatprep.mubr.bf16.mxu0 %v62_v8  ;;  %645 = vmatprep.subr.bf16.mxu1 %v703_v12  ;;  %v699_v16 = vld [vmem:[#allocation3 + $0x8] sm:$0xff]   ;;  %v709_v17 = vld [vmem:[#allocation6 + $0x60] sm:$0xff]   ;;  %v711_v19 = vld [vmem:[#allocation6 + $0x58] sm:$0xff]  }
  0x22   :  { %217 = vperm.xlu1 %692, %v199_v10   ;;  %646 = vmatpush3.bf16.msra.mxu1 %v703_v12  ;;  %v700_v18 = vld [vmem:[#allocation3] sm:$0xff]   ;;  %v701_v20 = vld [vmem:[#allocation6 + $0x38] sm:$0xff]   ;;  %v702_v22 = vld [vmem:[#allocation6 + $0x30] sm:$0xff]  }
  0x23   :  { %628 = vmatpush3.bf16.msra.mxu0 %v694_v2  ;;  %647 = vmatprep.subr.bf16.mxu1 %v705_v13  ;;  %v704_v23 = vld [vmem:[#allocation6 + $0x28] sm:$0xff]   ;;  %v706_v24 = vld [vmem:[#allocation6 + $0x20] sm:$0xff]   ;;  %v708_v25 = vld [vmem:[#allocation6 + $0x18] sm:$0xff]  }
  0x24   :  { %629 = vmatprep.subr.bf16.mxu0 %v695_v3  ;;  %207 = vperm.xlu0 %691, %v197_v9   ;;  %v710_v26 = vld [vmem:[#allocation6 + $0x10] sm:$0xff]   ;;  %v712_v27 = vld [vmem:[#allocation6 + $0x8] sm:$0xff]   ;;  %v714_v29 = vld [vmem:[#allocation6] sm:$0xff]  }
  0x25   :  { %v713_v28 = vld [vmem:[#allocation6 + $0x50] sm:$0xff]   ;;  %v715_v30 = vld [vmem:[#allocation6 + $0x48] sm:$0xff]   ;;  %v716_v31 = vld [vmem:[%s878_s2] sm:$0xff]  }
  0x26   :  { %648 = vmatpush3.bf16.msra.mxu1 %v705_v13  ;;  %v717_v32 = vld [vmem:[%s878_s2 + $0x8] sm:$0xff]   ;;  %v718_v33 = vld [vmem:[#allocation6 + $0x40] sm:$0xff]  }
  0x27   :  { %630 = vmatpush3.bf16.msra.mxu0 %v695_v3  ;;  %649 = vmatprep.subr.bf16.mxu1 %v707_v15  ;;  %v571_v51 = vld [vmem:[%s881_s5] ss:$0 sm:$0xff]  ;;  %s798_s5 = smov [#allocation8]  }
  0x28   :  { %631 = vmatprep.subr.bf16.mxu0 %v696_v4  ;;  %s532_s20 = sshll.u32 %s798_s5, 4  ;;  %s533_s20 = int_to_ptr.vmem [resolvable:$true] %s532_s20 }
  0x29   :  { %s767_s21 = scalar_lea.vmem %s533_s20, 256  ;;  %p772_p11 = scmp.lt.s32.totalorder %s533_s20, %s533_s20 }
  0x2a   :  { %650 = vmatpush3.bf16.msra.mxu1 %v707_v15  ;;  %p768_p10 = scmp.ne.s32.totalorder %s533_s20, %s767_s21  ;;  %p773_p12 = scmp.lt.s32.totalorder %s767_s21, %s767_s21 }
  0x2b   :  { %632 = vmatpush3.bf16.msra.mxu0 %v696_v4  ;;  %651 = vmatprep.subr.bf16.mxu1 %v709_v17 }
  0x2c   :  { %633 = vmatprep.subr.bf16.mxu0 %v697_v11  ;;  %p774_p13 = por %p773_p12, %p772_p11 }
  0x2e   :  { %652 = vmatpush3.bf16.msra.mxu1 %v709_v17  ;;  %p775_p0 = pnand %p774_p13, %p768_p10 }
  0x2f   :  { %634 = vmatpush3.bf16.msra.mxu0 %v697_v11  ;;  %653 = vmatprep.subr.bf16.mxu1 %v711_v19 }
  0x30   :  { %635 = vmatprep.subr.bf16.mxu0 %v698_v14 }
  0x32   :  { %654 = vmatpush3.bf16.msra.mxu1 %v711_v19 }
  0x33   :  { %636 = vmatpush3.bf16.msra.mxu0 %v698_v14  ;;  %655 = vmatprep.subr.bf16.mxu1 %v713_v28 }
  0x34   :  { %637 = vmatprep.subr.bf16.mxu0 %v699_v16 }
  0x36   :  { %656 = vmatpush3.bf16.msra.mxu1 %v713_v28 }
  0x37   :  { %638 = vmatpush3.bf16.msra.mxu0 %v699_v16  ;;  %657 = vmatprep.subr.bf16.mxu1 %v715_v30 }
  0x38   :  { %639 = vmatprep.subr.bf16.mxu0 %v700_v18 }
  0x3a   :  { %658 = vmatpush3.bf16.msra.mxu1 %v715_v30 }
  0x3b   :  { %640 = vmatpush3.bf16.msra.mxu0 %v700_v18  ;;  %659 = vmatprep.subr.bf16.mxu1 %v718_v33 }
  0x3c   :  { %665 = vmatprep.subr.bf16.mxu0 %v701_v20 }
  0x3e   :  { %642 = vmatmul.mubr.bf16.vlgmr.msra.gmra.mxu0 %v63_v21  ;;  %660 = vmatpush3.bf16.msra.mxu1 %v718_v33 }
  0x3f   :  { %666 = vmatpush3.bf16.msra.mxu0 %v701_v20  ;;  %681 = vmatprep.mubr.bf16.mxu0 %v716_v31 }
  0x40   :  { %667 = vmatprep.subr.bf16.mxu0 %v702_v22 }
  0x43   :  { %668 = vmatpush3.bf16.msra.mxu0 %v702_v22 }
  0x44   :  { %669 = vmatprep.subr.bf16.mxu0 %v704_v23 }
  0x47   :  { %670 = vmatpush3.bf16.msra.mxu0 %v704_v23 }
  0x48   :  { %671 = vmatprep.subr.bf16.mxu0 %v706_v24 }
  0x4b   :  { %672 = vmatpush3.bf16.msra.mxu0 %v706_v24 }
  0x4c   :  { %673 = vmatprep.subr.bf16.mxu0 %v708_v25 }
  0x4f   :  { %674 = vmatpush3.bf16.msra.mxu0 %v708_v25 }
  0x50   :  { %675 = vmatprep.subr.bf16.mxu0 %v710_v26 }
  0x53   :  { %676 = vmatpush3.bf16.msra.mxu0 %v710_v26 }
  0x54   :  { %677 = vmatprep.subr.bf16.mxu0 %v712_v27 }
  0x57   :  { %678 = vmatpush3.bf16.msra.mxu0 %v712_v27 }
  0x58   :  { %679 = vmatprep.subr.bf16.mxu0 %v714_v29 }
  0x5b   :  { %680 = vmatpush3.bf16.msra.mxu0 %v714_v29 }
  0x5e   :  { %682 = vmatmul.mubr.bf16.vlgmr.msra.gmra.mxu0 %v717_v32 }
  0x99   :  { %v213_v34 = vpop.permute.xlu1 %212 }
  0x9b   :  { %v203_v35 = vpop.permute.xlu0 %202 }
  0x9d   :  { %v218_v38 = vpop.permute.xlu1 %217 }
  0x9f   :  { %v208_v40 = vpop.permute.xlu0 %207 }
  0xfe   :  { %v643_v36 = vpop.f32.mrf.mxu0 }
  0xff   :  { %v222_v45 = vmul.f32 %v643_v36, %v213_v34 }
 0x100   :  { %v166_v37 = vpop.f32.mrf.mxu0 }
 0x101   :  { %v220_v43 = vmul.f32 %v203_v35, %v166_v37 }
 0x102   :  { %v644_v39 = vpop.f32.mrf.mxu0 }
 0x103   :  { %v223_v41 = vmul.f32 %v644_v39, %v218_v38 }
 0x104   :  { %v169_v42 = vpop.f32.mrf.mxu0 }
 0x105   :  { %v221_v44 = vmul.f32 %v208_v40, %v169_v42  ;;  %v225_v47 = vpack.c.bf16 %v223_v41, %v222_v45 }
 0x107   :  { %v224_v46 = vpack.c.bf16 %v221_v44, %v220_v43 }
 0x109   :  { %661 = vmatprep.mubr.bf16.mxu1 %v224_v46 }
 0x10a   :  { %662 = vmatmul.mubr.bf16.vlgmr.msra.gmra.mxu1 %v225_v47 }
 0x11e   :  { %v683_v48 = vpop.f32.mrf.mxu0 }
 0x120   :  { %v453_v49 = vpop.f32.mrf.mxu0 }
 0x122   :  { %v684_v54 = vpop.f32.mrf.mxu0 }
 0x124   :  { %v456_v62 = vpop.f32.mrf.mxu0 }
 0x1ca   :  { %v663_v50 = vpop.f32.mrf.mxu1 }
 0x1cb   :  { %v462_v52 = vadd.f32 %v683_v48, %v663_v50 }
 0x1cc   :  { %v344_v53 = vpop.f32.mrf.mxu1 }
 0x1cd   :  { %v477_v55 = vadd.f32 %v571_v51, %v462_v52  ;;  %v454_v56 = vadd.f32 %v453_v49, %v344_v53 }
 0x1ce   :  { %v664_v57 = vpop.f32.mrf.mxu1 }
 0x1cf   :  { %v487_v58 = vmul.f32 1.442695, %v477_v55  ;;  %v475_v59 = vadd.f32 %v571_v51, %v454_v56  ;;  %v465_v60 = vadd.f32 %v684_v54, %v664_v57  ;;  %vm481_vm0 = vcmp.gt.f32.partialorder %v477_v55, 0.0 }
 0x1d0   :  { %v347_v61 = vpop.f32.mrf.mxu1 }
 0x1d1   :  { %719 = vpow2.f32 %v487_v58  ;;  %v483_v63 = vmul.f32 1.442695, %v475_v59  ;;  %v478_v0 = vadd.f32 %v571_v51, %v465_v60  ;;  %v457_v1 = vadd.f32 %v456_v62, %v347_v61 }
 0x1d2   :  { %vm479_vm2 = vcmp.gt.f32.partialorder %v475_v59, 0.0 }
 0x1d3   :  { %721 = vpow2.f32 %v483_v63  ;;  %v489_v2 = vmul.f32 1.442695, %v478_v0  ;;  %v476_v3 = vadd.f32 %v571_v51, %v457_v1  ;;  %vm482_vm1 = vcmp.gt.f32.partialorder %v478_v0, 0.0 }
 0x1d5   :  { %723 = vpow2.f32 %v489_v2  ;;  %v485_v4 = vmul.f32 1.442695, %v476_v3  ;;  %vm480_vm3 = vcmp.gt.f32.partialorder %v476_v3, 0.0 }
 0x1d7   :  { %725 = vpow2.f32 %v485_v4 }
 0x1de   :  { %v720_v5 = vpop.eup %719 }
 0x1df   :  { %v574_v6 = vadd.f32 -1.0, %v720_v5 }
 0x1e0   :  { %v722_v7 = vpop.eup %721 }
 0x1e1   :  { %v497_v8 = vmul.f32 1.6732632, %v574_v6  ;;  %v572_v9 = vadd.f32 -1.0, %v722_v7 }
 0x1e2   :  { %v724_v10 = vpop.eup %723 }
 0x1e3   :  { %v575_v11 = vadd.f32 -1.0, %v724_v10  ;;  %v495_v12 = vmul.f32 1.6732632, %v572_v9  ;;  %v501_v14 = vsel %vm481_vm0, %v477_v55, %v497_v8 }
 0x1e4   :  { %v726_v13 = vpop.eup %725  ;;  %v505_v18 = vmul.f32 1.050701, %v501_v14 }
 0x1e5   :  { %v498_v15 = vmul.f32 1.6732632, %v575_v11  ;;  %v573_v16 = vadd.f32 -1.0, %v726_v13  ;;  %v499_v19 = vsel %vm479_vm2, %v475_v59, %v495_v12 }
 0x1e6   :  { %v503_v24 = vmul.f32 1.050701, %v499_v19 }
 0x1e7   :  { %v502_v17 = vsel %vm482_vm1, %v478_v0, %v498_v15  ;;  %v496_v21 = vmul.f32 1.6732632, %v573_v16 }
 0x1e8   :  { %v506_v20 = vmul.f32 1.050701, %v502_v17 }
 0x1e9   :  { %v500_v22 = vsel %vm480_vm3, %v476_v3, %v496_v21 }
 0x1ea   :  { %v592_v23 = vpack.c.bf16 %v506_v20, %v505_v18  ;;  %v504_v25 = vmul.f32 1.050701, %v500_v22 }
 0x1ec   :  { %594 = vst [vmem:[#allocation8 + $0x8] sm:$0xff] %v592_v23   ;;  %v587_v26 = vpack.c.bf16 %v504_v25, %v503_v24 }
 0x1ee   :  { %588 = vst [vmem:[#allocation8] sm:$0xff] %v587_v26  }
 0x1ef   :  { %778 = shalt.err (!%p775_p0)
}
 0x1f0   :  { %538 = dma.vmem_to_hbm [thread:$0]  %s533_s20, 256, %s882_s6, [#allocation5], %s794_s24, %s794_s24, %s795_s25  }
 0x1f1   :  { %791 = dma.done.wait [#allocation5], 256  }
 0x1f2   :  { %792 = vsyncadd [#allocation5], 4294967040 }
 0x1f3   :  { %542 = vsyncpa [#allocation4], 1 }
 0x1f4   :  { %543 = vsyncpa [#allocation7], 1 }
 0x1f5   :  { %544 = vsyncpa [#allocation5], 1 }

// kernel: tpu_custom_call.1
= control target key start
LH: loop header
LB: loop body
LE: loop exit
PB: predicated region body
PF: predicated region fallthrough
CT: control target
= control target key end

     0   :  { %11 = vsyncpa [#allocation4], 0  ;;  %s876_s0 = inlined_call_operand.vmem [shape: s8[32,128], index: 0, kind: input, shape index: {}]   ;;  %s877_s1 = inlined_call_operand.hbm [shape: bf16[128,128], index: 1, kind: input, shape index: {}]   ;;  %s878_s2 = inlined_call_operand.vmem [shape: bf16[32,128], index: 2, kind: input, shape index: {}]   ;;  %s879_s3 = inlined_call_operand.vmem [shape: f32[32,1], index: 3, kind: input, shape index: {}]   ;;  %s880_s4 = inlined_call_operand.hbm [shape: bf16[256,128], index: 4, kind: input, shape index: {}]   ;;  %s881_s5 = inlined_call_operand.vmem [shape: f32[1,128], index: 5, kind: input, shape index: {}]   ;;  %s882_s6 = inlined_call_operand.hbm [shape: bf16[32,128], index: 6, kind: output, shape index: {}]  }
   0x1   :  { %12 = vsyncpa [#allocation7], 0 }
   0x2   :  { %13 = vsyncpa [#allocation5], 0  ;;  %s793_s21 = smov [#allocation3]  }
   0x3   :  { %s21_s22 = sshll.u32 %s793_s21, 4  ;;  %s22_s22 = int_to_ptr.vmem [resolvable:$true] %s21_s22 }
   0x4   :  { %s735_s23 = scalar_lea.vmem %s22_s22, 1024  ;;  %p740_p1 = scmp.lt.s32.totalorder %s22_s22, %s22_s22 }
   0x5   :  { %p736_p0 = scmp.ne.s32.totalorder %s22_s22, %s735_s23  ;;  %p741_p2 = scmp.lt.s32.totalorder %s735_s23, %s735_s23 }
   0x7   :  { %p742_p3 = por %p741_p2, %p740_p1 }
   0x9   :  { %p743_p4 = pnand %p742_p3, %p736_p0 }
   0xb   :  { %746 = shalt.err (!%p743_p4)
}
   0xc   :  { %s794_s24 = smov 64   ;;  %s795_s25 = smov 4  }
   0xd   :  { %27 = dma.hbm_to_vmem [thread:$0]  %s877_s1, 1024, %s22_s22, [#allocation4], %s794_s24, %s794_s24, %s795_s25  }
   0xe   :  { %s796_s28 = smov [#allocation6]  }
   0xf   :  { %s37_s29 = sshll.u32 %s796_s28, 4  ;;  %s38_s29 = int_to_ptr.vmem [resolvable:$true] %s37_s29 }
  0x10   :  { %s755_s30 = scalar_lea.vmem %s38_s29, 2048  ;;  %p760_p6 = scmp.lt.s32.totalorder %s38_s29, %s38_s29 }
  0x11   :  { %p756_p5 = scmp.ne.s32.totalorder %s38_s29, %s755_s30  ;;  %p761_p7 = scmp.lt.s32.totalorder %s755_s30, %s755_s30 }
  0x13   :  { %p762_p8 = por %p761_p7, %p760_p6 }
  0x15   :  { %p763_p9 = pnand %p762_p8, %p756_p5 }
  0x17   :  { %766 = shalt.err (!%p763_p9)
}
  0x18   :  { %43 = dma.hbm_to_vmem [thread:$0]  %s880_s4, 2048, %s38_s29, [#allocation7], %s794_s24, %s794_s24, %s795_s25  }
  0x19   :  { %787 = dma.done.wait [#allocation4], 1024  }
  0x1a   :  { %788 = vsyncadd [#allocation4], 4294966272 }
  0x1b   :  { %789 = dma.done.wait [#allocation7], 2048  }
  0x1c   :  { %790 = vsyncadd [#allocation7], 4294965248  ;;  %v797_v0 = vmov 0   ;;  %v693_v1 = vld [vmem:[#allocation3 + $0x38] sm:$0xff]   ;;  %v694_v2 = vld [vmem:[#allocation3 + $0x30] sm:$0xff]  }
  0x1d   :  { %691 = vset.pattern.permute.xlu0 %v797_v0  ;;  %692 = vset.pattern.permute.xlu1 %v797_v0  ;;  %v695_v3 = vld [vmem:[#allocation3 + $0x28] sm:$0xff]   ;;  %v696_v4 = vld [vmem:[#allocation3 + $0x20] sm:$0xff]   ;;  %v198_v7 = vld [vmem:[%s879_s3 + $0x10] sm:$0xff] }
  0x1e   :  { %625 = vmatprep.subr.bf16.mxu0 %v693_v1  ;;  %v61_v5 = vld [vmem:[%s876_s0] sm:$0xff]  ;;  %212 = vperm.xlu1 %692, %v198_v7   ;;  %v197_v9 = vld [vmem:[%s879_s3 + $0x8] sm:$0xff]  ;;  %v199_v10 = vld [vmem:[%s879_s3 + $0x18] sm:$0xff] }
  0x1f   :  { %626 = vmatpush3.bf16.msra.mxu0 %v693_v1  ;;  %v196_v6 = vld [vmem:[%s879_s3] sm:$0xff]  ;;  %v62_v8 = vunpack.c.l.s8.bf16 %v61_v5  ;;  %v697_v11 = vld [vmem:[#allocation3 + $0x18] sm:$0xff]   ;;  %v705_v13 = vld [vmem:[#allocation6 + $0x70] sm:$0xff]   ;;  %v63_v21 = vunpack.c.h.s8.bf16 %v61_v5 }
  0x20   :  { %627 = vmatprep.subr.bf16.mxu0 %v694_v2  ;;  %202 = vperm.xlu0 %691, %v196_v6   ;;  %v703_v12 = vld [vmem:[#allocation6 + $0x78] sm:$0xff]   ;;  %v698_v14 = vld [vmem:[#allocation3 + $0x10] sm:$0xff]   ;;  %v707_v15 = vld [vmem:[#allocation6 + $0x68] sm:$0xff]  }
  0x21   :  { %641 = vmatprep.mubr.bf16.mxu0 %v62_v8  ;;  %645 = vmatprep.subr.bf16.mxu1 %v703_v12  ;;  %v699_v16 = vld [vmem:[#allocation3 + $0x8] sm:$0xff]   ;;  %v709_v17 = vld [vmem:[#allocation6 + $0x60] sm:$0xff]   ;;  %v711_v19 = vld [vmem:[#allocation6 + $0x58] sm:$0xff]  }
  0x22   :  { %217 = vperm.xlu1 %692, %v199_v10   ;;  %646 = vmatpush3.bf16.msra.mxu1 %v703_v12  ;;  %v700_v18 = vld [vmem:[#allocation3] sm:$0xff]   ;;  %v701_v20 = vld [vmem:[#allocation6 + $0x38] sm:$0xff]   ;;  %v702_v22 = vld [vmem:[#allocation6 + $0x30] sm:$0xff]  }
  0x23   :  { %628 = vmatpush3.bf16.msra.mxu0 %v694_v2  ;;  %647 = vmatprep.subr.bf16.mxu1 %v705_v13  ;;  %v704_v23 = vld [vmem:[#allocation6 + $0x28] sm:$0xff]   ;;  %v706_v24 = vld [vmem:[#allocation6 + $0x20] sm:$0xff]   ;;  %v708_v25 = vld [vmem:[#allocation6 + $0x18] sm:$0xff]  }
  0x24   :  { %629 = vmatprep.subr.bf16.mxu0 %v695_v3  ;;  %207 = vperm.xlu0 %691, %v197_v9   ;;  %v710_v26 = vld [vmem:[#allocation6 + $0x10] sm:$0xff]   ;;  %v712_v27 = vld [vmem:[#allocation6 + $0x8] sm:$0xff]   ;;  %v714_v29 = vld [vmem:[#allocation6] sm:$0xff]  }
  0x25   :  { %v713_v28 = vld [vmem:[#allocation6 + $0x50] sm:$0xff]   ;;  %v715_v30 = vld [vmem:[#allocation6 + $0x48] sm:$0xff]   ;;  %v716_v31 = vld [vmem:[%s878_s2] sm:$0xff]  }
  0x26   :  { %648 = vmatpush3.bf16.msra.mxu1 %v705_v13  ;;  %v717_v32 = vld [vmem:[%s878_s2 + $0x8] sm:$0xff]   ;;  %v718_v33 = vld [vmem:[#allocation6 + $0x40] sm:$0xff]  }
  0x27   :  { %630 = vmatpush3.bf16.msra.mxu0 %v695_v3  ;;  %649 = vmatprep.subr.bf16.mxu1 %v707_v15  ;;  %v571_v51 = vld [vmem:[%s881_s5] ss:$0 sm:$0xff]  ;;  %s798_s5 = smov [#allocation8]  }
  0x28   :  { %631 = vmatprep.subr.bf16.mxu0 %v696_v4  ;;  %s532_s20 = sshll.u32 %s798_s5, 4  ;;  %s533_s20 = int_to_ptr.vmem [resolvable:$true] %s532_s20 }
  0x29   :  { %s767_s21 = scalar_lea.vmem %s533_s20, 256  ;;  %p772_p11 = scmp.lt.s32.totalorder %s533_s20, %s533_s20 }
  0x2a   :  { %650 = vmatpush3.bf16.msra.mxu1 %v707_v15  ;;  %p768_p10 = scmp.ne.s32.totalorder %s533_s20, %s767_s21  ;;  %p773_p12 = scmp.lt.s32.totalorder %s767_s21, %s767_s21 }
  0x2b   :  { %632 = vmatpush3.bf16.msra.mxu0 %v696_v4  ;;  %651 = vmatprep.subr.bf16.mxu1 %v709_v17 }
  0x2c   :  { %633 = vmatprep.subr.bf16.mxu0 %v697_v11  ;;  %p774_p13 = por %p773_p12, %p772_p11 }
  0x2e   :  { %652 = vmatpush3.bf16.msra.mxu1 %v709_v17  ;;  %p775_p0 = pnand %p774_p13, %p768_p10 }
  0x2f   :  { %634 = vmatpush3.bf16.msra.mxu0 %v697_v11  ;;  %653 = vmatprep.subr.bf16.mxu1 %v711_v19 }
  0x30   :  { %635 = vmatprep.subr.bf16.mxu0 %v698_v14 }
  0x32   :  { %654 = vmatpush3.bf16.msra.mxu1 %v711_v19 }
  0x33   :  { %636 = vmatpush3.bf16.msra.mxu0 %v698_v14  ;;  %655 = vmatprep.subr.bf16.mxu1 %v713_v28 }
  0x34   :  { %637 = vmatprep.subr.bf16.mxu0 %v699_v16 }
  0x36   :  { %656 = vmatpush3.bf16.msra.mxu1 %v713_v28 }
  0x37   :  { %638 = vmatpush3.bf16.msra.mxu0 %v699_v16  ;;  %657 = vmatprep.subr.bf16.mxu1 %v715_v30 }
  0x38   :  { %639 = vmatprep.subr.bf16.mxu0 %v700_v18 }
  0x3a   :  { %658 = vmatpush3.bf16.msra.mxu1 %v715_v30 }
  0x3b   :  { %640 = vmatpush3.bf16.msra.mxu0 %v700_v18  ;;  %659 = vmatprep.subr.bf16.mxu1 %v718_v33 }
  0x3c   :  { %665 = vmatprep.subr.bf16.mxu0 %v701_v20 }
  0x3e   :  { %642 = vmatmul.mubr.bf16.vlgmr.msra.gmra.mxu0 %v63_v21  ;;  %660 = vmatpush3.bf16.msra.mxu1 %v718_v33 }
  0x3f   :  { %666 = vmatpush3.bf16.msra.mxu0 %v701_v20  ;;  %681 = vmatprep.mubr.bf16.mxu0 %v716_v31 }
  0x40   :  { %667 = vmatprep.subr.bf16.mxu0 %v702_v22 }
  0x43   :  { %668 = vmatpush3.bf16.msra.mxu0 %v702_v22 }
  0x44   :  { %669 = vmatprep.subr.bf16.mxu0 %v704_v23 }
  0x47   :  { %670 = vmatpush3.bf16.msra.mxu0 %v704_v23 }
  0x48   :  { %671 = vmatprep.subr.bf16.mxu0 %v706_v24 }
  0x4b   :  { %672 = vmatpush3.bf16.msra.mxu0 %v706_v24 }
  0x4c   :  { %673 = vmatprep.subr.bf16.mxu0 %v708_v25 }
  0x4f   :  { %674 = vmatpush3.bf16.msra.mxu0 %v708_v25 }
  0x50   :  { %675 = vmatprep.subr.bf16.mxu0 %v710_v26 }
  0x53   :  { %676 = vmatpush3.bf16.msra.mxu0 %v710_v26 }
  0x54   :  { %677 = vmatprep.subr.bf16.mxu0 %v712_v27 }
  0x57   :  { %678 = vmatpush3.bf16.msra.mxu0 %v712_v27 }
  0x58   :  { %679 = vmatprep.subr.bf16.mxu0 %v714_v29 }
  0x5b   :  { %680 = vmatpush3.bf16.msra.mxu0 %v714_v29 }
  0x5e   :  { %682 = vmatmul.mubr.bf16.vlgmr.msra.gmra.mxu0 %v717_v32 }
  0x99   :  { %v213_v34 = vpop.permute.xlu1 %212 }
  0x9b   :  { %v203_v35 = vpop.permute.xlu0 %202 }
  0x9d   :  { %v218_v38 = vpop.permute.xlu1 %217 }
  0x9f   :  { %v208_v40 = vpop.permute.xlu0 %207 }
  0xfe   :  { %v643_v36 = vpop.f32.mrf.mxu0 }
  0xff   :  { %v222_v45 = vmul.f32 %v643_v36, %v213_v34 }
 0x100   :  { %v166_v37 = vpop.f32.mrf.mxu0 }
 0x101   :  { %v220_v43 = vmul.f32 %v203_v35, %v166_v37 }
 0x102   :  { %v644_v39 = vpop.f32.mrf.mxu0 }
 0x103   :  { %v223_v41 = vmul.f32 %v644_v39, %v218_v38 }
 0x104   :  { %v169_v42 = vpop.f32.mrf.mxu0 }
 0x105   :  { %v221_v44 = vmul.f32 %v208_v40, %v169_v42  ;;  %v225_v47 = vpack.c.bf16 %v223_v41, %v222_v45 }
 0x107   :  { %v224_v46 = vpack.c.bf16 %v221_v44, %v220_v43 }
 0x109   :  { %661 = vmatprep.mubr.bf16.mxu1 %v224_v46 }
 0x10a   :  { %662 = vmatmul.mubr.bf16.vlgmr.msra.gmra.mxu1 %v225_v47 }
 0x11e   :  { %v683_v48 = vpop.f32.mrf.mxu0 }
 0x120   :  { %v453_v49 = vpop.f32.mrf.mxu0 }
 0x122   :  { %v684_v54 = vpop.f32.mrf.mxu0 }
 0x124   :  { %v456_v62 = vpop.f32.mrf.mxu0 }
 0x1ca   :  { %v663_v50 = vpop.f32.mrf.mxu1 }
 0x1cb   :  { %v462_v52 = vadd.f32 %v683_v48, %v663_v50 }
 0x1cc   :  { %v344_v53 = vpop.f32.mrf.mxu1 }
 0x1cd   :  { %v477_v55 = vadd.f32 %v571_v51, %v462_v52  ;;  %v454_v56 = vadd.f32 %v453_v49, %v344_v53 }
 0x1ce   :  { %v664_v57 = vpop.f32.mrf.mxu1 }
 0x1cf   :  { %v487_v58 = vmul.f32 1.442695, %v477_v55  ;;  %v475_v59 = vadd.f32 %v571_v51, %v454_v56  ;;  %v465_v60 = vadd.f32 %v684_v54, %v664_v57  ;;  %vm481_vm0 = vcmp.gt.f32.partialorder %v477_v55, 0.0 }
 0x1d0   :  { %v347_v61 = vpop.f32.mrf.mxu1 }
 0x1d1   :  { %719 = vpow2.f32 %v487_v58  ;;  %v483_v63 = vmul.f32 1.442695, %v475_v59  ;;  %v478_v0 = vadd.f32 %v571_v51, %v465_v60  ;;  %v457_v1 = vadd.f32 %v456_v62, %v347_v61 }
 0x1d2   :  { %vm479_vm2 = vcmp.gt.f32.partialorder %v475_v59, 0.0 }
 0x1d3   :  { %721 = vpow2.f32 %v483_v63  ;;  %v489_v2 = vmul.f32 1.442695, %v478_v0  ;;  %v476_v3 = vadd.f32 %v571_v51, %v457_v1  ;;  %vm482_vm1 = vcmp.gt.f32.partialorder %v478_v0, 0.0 }
 0x1d5   :  { %723 = vpow2.f32 %v489_v2  ;;  %v485_v4 = vmul.f32 1.442695, %v476_v3  ;;  %vm480_vm3 = vcmp.gt.f32.partialorder %v476_v3, 0.0 }
 0x1d7   :  { %725 = vpow2.f32 %v485_v4 }
 0x1de   :  { %v720_v5 = vpop.eup %719 }
 0x1df   :  { %v574_v6 = vadd.f32 -1.0, %v720_v5 }
 0x1e0   :  { %v722_v7 = vpop.eup %721 }
 0x1e1   :  { %v497_v8 = vmul.f32 1.6732632, %v574_v6  ;;  %v572_v9 = vadd.f32 -1.0, %v722_v7 }
 0x1e2   :  { %v724_v10 = vpop.eup %723 }
 0x1e3   :  { %v575_v11 = vadd.f32 -1.0, %v724_v10  ;;  %v495_v12 = vmul.f32 1.6732632, %v572_v9  ;;  %v501_v14 = vsel %vm481_vm0, %v477_v55, %v497_v8 }
 0x1e4   :  { %v726_v13 = vpop.eup %725  ;;  %v505_v18 = vmul.f32 1.050701, %v501_v14 }
 0x1e5   :  { %v498_v15 = vmul.f32 1.6732632, %v575_v11  ;;  %v573_v16 = vadd.f32 -1.0, %v726_v13  ;;  %v499_v19 = vsel %vm479_vm2, %v475_v59, %v495_v12 }
 0x1e6   :  { %v503_v24 = vmul.f32 1.050701, %v499_v19 }
 0x1e7   :  { %v502_v17 = vsel %vm482_vm1, %v478_v0, %v498_v15  ;;  %v496_v21 = vmul.f32 1.6732632, %v573_v16 }
 0x1e8   :  { %v506_v20 = vmul.f32 1.050701, %v502_v17 }
 0x1e9   :  { %v500_v22 = vsel %vm480_vm3, %v476_v3, %v496_v21 }
 0x1ea   :  { %v592_v23 = vpack.c.bf16 %v506_v20, %v505_v18  ;;  %v504_v25 = vmul.f32 1.050701, %v500_v22 }
 0x1ec   :  { %594 = vst [vmem:[#allocation8 + $0x8] sm:$0xff] %v592_v23   ;;  %v587_v26 = vpack.c.bf16 %v504_v25, %v503_v24 }
 0x1ee   :  { %588 = vst [vmem:[#allocation8] sm:$0xff] %v587_v26  }
 0x1ef   :  { %778 = shalt.err (!%p775_p0)
}
 0x1f0   :  { %538 = dma.vmem_to_hbm [thread:$0]  %s533_s20, 256, %s882_s6, [#allocation5], %s794_s24, %s794_s24, %s795_s25  }
 0x1f1   :  { %791 = dma.done.wait [#allocation5], 256  }
 0x1f2   :  { %792 = vsyncadd [#allocation5], 4294967040 }
 0x1f3   :  { %542 = vsyncpa [#allocation4], 1 }
 0x1f4   :  { %543 = vsyncpa [#allocation7], 1 }
 0x1f5   :  { %544 = vsyncpa [#allocation5], 1 }

</bundles_post_ra>
